<compile_context>
chip_gen: v7x
topology: tpu7x:2x2x1
jax: 0.10.0
libtpu: 0.0.40
codegen_flags: <defaults>
</compile_context>

<pallas_src>
import functools

import jax
import jax.numpy as jnp
import numpy as np
from jax import lax
from jax.experimental import pallas as pl
from jax.experimental.pallas import tpu as pltpu


def _round_up(x, m):
    return (x + m - 1) // m * m


def _recurrence_kernel(alpha_ref,    # SMEM (1,)                    f32
                       drive_ref,    # VMEM (Tc, Bblk, n_pad)       f32 (shifted drive)
                       w_rec_t_ref,  # VMEM (n_pad, n_pad)          f32 (= W_rec^T, padded)
                       states_ref,   # VMEM (Tc, Bblk, n_pad)       f32 (output chunk)
                       h_ref,        # VMEM (Bblk, n_pad)           f32 (carry across chunks)
                       *, tc):
    """One (batch-shard, time-chunk) grid step of the leaky-ReLU recurrence.

    states[j] = (1-alpha)*states[j-1] + alpha*relu(states[j-1] @ W_rec^T + drive[j-1])

    `drive_ref[j]` holds drive[j-1] (shifted by one timestep in the wrapper);
    the very first row (t == 0) holds a large negative sentinel so that
    states[0] == 0 exactly, with no per-step branch.
    """
    alpha = alpha_ref[0]
    w = w_rec_t_ref[...]                     # small, stays resident (constant index_map)

    # First time-chunk of this batch shard: zero the carried hidden state.
    @pl.when(pl.program_id(1) == 0)
    def _():
        h_ref[...] = jnp.zeros_like(h_ref)

    def step(j, h):
        pre = jnp.dot(h, w, preferred_element_type=jnp.float32) + drive_ref[j]
        h_new = (1.0 - alpha) * h + alpha * jnp.maximum(pre, 0.0)
        states_ref[j] = h_new
        return h_new

    # h carried in registers; fully unrolled so MXU latency of step j overlaps
    # the VPU lerp/relu of step j-1.
    h_ref[...] = lax.fori_loop(0, tc, step, h_ref[...], unroll=True)


def perturbation_forward(u, p, alpha, noise_raw, w_rec, w_in, w_out, sigma_rec,
                         *, time_chunk=4):
    """u: (B, T, 6), p: (B, n), noise_raw: (B, T, n) ~ N(0,1).

    Returns (out: (B, T, 2), states: (B, T, n)) matching the PyTorch module.
    """
    f32 = jnp.float32
    B, T, _ = u.shape
    n = w_rec.shape[0]

    u = u.astype(f32)
    p = p.astype(f32)
    noise_raw = noise_raw.astype(f32)
    w_rec = w_rec.astype(f32)
    w_in = w_in.astype(f32)
    w_out = w_out.astype(f32)
    alpha_f = jnp.asarray(alpha, f32)

    noise_scale = jnp.sqrt(2.0 * alpha_f * jnp.asarray(sigma_rec, f32) ** 2)

    # ---- Hoisted input drive (one batched matmul, outside the recurrence) ----
    #   drive[:, i] = u[:, i] @ W_in^T + noise_scale * noise[:, i] + p
    drive = (jnp.einsum('bti,ni->btn', u, w_in)
             + noise_scale * noise_raw
             + p[:, None, :])                                  # (B, T, n)

    # Time-major and shifted by one: states[j] = f(states[j-1], drive[j-1]).
    drive_tm = jnp.transpose(drive, (1, 0, 2))                 # (T, B, n)
    # Sentinel at t=0: relu(0@W + (-1e30)) == 0  =>  states[0] == 0 exactly.
    drive_shift = jnp.concatenate(
        [jnp.full((1, B, n), -1e30, f32), drive_tm[:T - 1]], axis=0)

    # ---- Pad to vreg-friendly shapes ----
    b_block = 8                                # sublane multiple, batch shard size
    tc = int(time_chunk)
    B_pad = _round_up(max(B, b_block), b_block)
    n_pad = _round_up(max(n, 128), 128)
    T_pad = _round_up(T, tc)

    drive_p = jnp.zeros((T_pad, B_pad, n_pad), f32).at[:T, :B, :n].set(drive_shift)
    w_rec_t_p = jnp.zeros((n_pad, n_pad), f32).at[:n, :n].set(w_rec.T)
    alpha_arr = jnp.reshape(alpha_f, (1,))

    kernel = functools.partial(_recurrence_kernel, tc=tc)

    states_tm = pl.pallas_call(
        kernel,
        out_shape=jax.ShapeDtypeStruct((T_pad, B_pad, n_pad), f32),
        grid=(B_pad // b_block, T_pad // tc),
        in_specs=[
            pl.BlockSpec(memory_space=pltpu.MemorySpace.SMEM),              # alpha
            pl.BlockSpec((tc, b_block, n_pad), lambda b, c: (c, b, 0)),     # drive
            pl.BlockSpec((n_pad, n_pad), lambda b, c: (0, 0)),              # W_rec^T
        ],
        out_specs=pl.BlockSpec((tc, b_block, n_pad), lambda b, c: (c, b, 0)),
        scratch_shapes=[pltpu.VMEM((b_block, n_pad), f32)],                 # h carry
        compiler_params=pltpu.CompilerParams(
            dimension_semantics=("parallel", "arbitrary")),
    )(alpha_arr, drive_p, w_rec_t_p)

    # Back to PyTorch (B, T, n); drop padding.
    states = jnp.transpose(states_tm[:T, :B, :n], (1, 0, 2))   # (B, T, n)
    # Output projection has no recurrence -> lane-dense XLA matmul.
    out = jnp.einsum('btn,on->bto', jnp.maximum(states, 0.0), w_out)  # (B, T, 2)
    return out, states


def perturbation_reference(u, p, alpha, noise_raw, w_rec, w_in, w_out, sigma_rec):
    """Pure-JAX reference mirroring the PyTorch loop (same noise)."""
    B, T, _ = u.shape
    n = w_rec.shape[0]
    noise = jnp.sqrt(2.0 * alpha * jnp.float32(sigma_rec) ** 2) * noise_raw
    h = jnp.zeros((B, n), dtype=jnp.float32)
    states = [h]
    for i in range(T - 1):
        pre = h @ w_rec.T + u[:, i] @ w_in.T + noise[:, i] + p
        h = (1.0 - alpha) * h + alpha * jnp.maximum(pre, 0.0)
        states.append(h)
    states = jnp.stack(states, axis=1)                 # (B, T, n)
    out = jnp.maximum(states, 0.0) @ w_out.T           # (B, T, 2)
    return out, states


if __name__ == "__main__":
    # Module hyper-params (tau is stored but unused in forward).
    tau = 100.0
    sigma_rec = 0.05
    n = 32
    input_size = 6
    output_size = 2

    # Small example shapes.
    B, T = 2, 8
    alpha = 0.2

    key = jax.random.PRNGKey(0)
    k_u, k_p, k_noise, k_wr, k_wi, k_wo = jax.random.split(key, 6)

    # TODO(synk): the module draws its noise internally via torch.empty().normal_();
    # here the N(0,1) draw is supplied as an explicit input for determinism
    # (in-kernel pltpu.prng_* generation would change numerics vs the reference).
    u = jax.random.normal(k_u, (B, T, input_size), dtype=jnp.float32)
    p = jax.random.normal(k_p, (B, n), dtype=jnp.float32) * 0.1
    noise_raw = jax.random.normal(k_noise, (B, T, n), dtype=jnp.float32)

    # Deterministic parameter init (nn.Linear-style uniform(-1/sqrt(fan_in), ..)).
    def linear_init(k, out_f, in_f):
        bound = 1.0 / np.sqrt(in_f)
        return jax.random.uniform(k, (out_f, in_f), jnp.float32, -bound, bound)

    w_rec = linear_init(k_wr, n, n)            # recurrent_layer.weight  (n, n)
    w_in = linear_init(k_wi, n, input_size)    # input_layer.weight      (n, 6)
    w_out = linear_init(k_wo, output_size, n)  # output_layer.weight     (2, n)

    out, states = perturbation_forward(u, p, alpha, noise_raw,
                                       w_rec, w_in, w_out, sigma_rec,
                                       time_chunk=4)
    out = jax.block_until_ready(out)
    states = jax.block_until_ready(states)

    out_ref, states_ref = perturbation_reference(u, p, alpha, noise_raw,
                                                 w_rec, w_in, w_out, sigma_rec)

    assert out.shape == (B, T, output_size)
    assert states.shape == (B, T, n)
    np.testing.assert_allclose(np.asarray(states), np.asarray(states_ref),
                               rtol=1e-5, atol=1e-5)
    np.testing.assert_allclose(np.asarray(out), np.asarray(out_ref),
                               rtol=1e-5, atol=1e-5)

    print("KERNEL_OK")
</pallas_src>

<mosaic_0001>
module attributes {stable_mosaic.version = 11 : i64} {
  func.func @_recurrence_kernel(%arg0: i32, %arg1: i32, %arg2: memref<1xf32, #tpu.memory_space<smem>>, %arg3: memref<4x8x128xf32, #tpu.memory_space<vmem>>, %arg4: memref<128x128xf32, #tpu.memory_space<vmem>>, %arg5: memref<4x8x128xf32, #tpu.memory_space<vmem>>, %arg6: memref<8x128xf32, #tpu.memory_space<vmem>>) attributes {dimension_semantics = [#tpu.dimension_semantics<parallel>, #tpu.dimension_semantics<arbitrary>], iteration_bounds = array<i64: 1, 2>, scalar_prefetch = 0 : i64, scratch_operands = 1 : i64, tpu.core_type = #tpu.core_type<tc>, window_params = [{transform_indices = @transform_0, window_bounds = array<i64: 1>}, {transform_indices = @transform_1, window_bounds = array<i64: 4, 8, 128>}, {pipeline_mode = #tpu.pipeline_mode<synchronous>, transform_indices = @transform_2, window_bounds = array<i64: 128, 128>}, {transform_indices = @transform_3, window_bounds = array<i64: 4, 8, 128>}]} {
    %c0 = arith.constant 0 : index
    %0 = memref.load %arg2[%c0] : memref<1xf32, #tpu.memory_space<smem>>
    %c0_0 = arith.constant 0 : index
    %c0_1 = arith.constant 0 : index
    %1 = vector.load %arg4[%c0_0, %c0_1] : memref<128x128xf32, #tpu.memory_space<vmem>>, vector<128x128xf32>
    %c0_i32 = arith.constant 0 : i32
    %2 = arith.cmpi eq, %arg1, %c0_i32 : i32
    %3 = arith.extui %2 : i1 to i32
    %c0_i32_2 = arith.constant 0 : i32
    %4 = arith.cmpi ne, %3, %c0_i32_2 : i32
    scf.if %4 {
      %cst_35 = arith.constant 0.000000e+00 : f32
      %75 = vector.broadcast %cst_35 : f32 to vector<8x128xf32>
      %c0_36 = arith.constant 0 : index
      %c0_37 = arith.constant 0 : index
      %76 = vector.load %arg6[%c0_36, %c0_37] : memref<8x128xf32, #tpu.memory_space<vmem>>, vector<8x128xf32>
      tpu.vector_store %arg6[%c0_36, %c0_37], %75 {strides = array<i32>} : memref<8x128xf32, #tpu.memory_space<vmem>>, vector<8x128xf32>,
    } else {
    }
    %c0_3 = arith.constant 0 : index
    %c0_4 = arith.constant 0 : index
    %5 = vector.load %arg6[%c0_3, %c0_4] : memref<8x128xf32, #tpu.memory_space<vmem>>, vector<8x128xf32>
    %c0_i32_5 = arith.constant 0 : i32
    %cst = arith.constant dense<0.000000e+00> : vector<8x128xf32>
    %6 = tpu.matmul %5, %1, %cst {dimension_numbers = #tpu.dot_dimension_numbers<[1], [0], [0], [1], [0, 0, 1, 1], [], []>} : vector<8x128xf32>, vector<128x128xf32>, vector<8x128xf32> -> vector<8x128xf32>
    %7 = arith.index_cast %c0_i32_5 : i32 to index
    %c0_6 = arith.constant 0 : index
    %c0_7 = arith.constant 0 : index
    %8 = vector.load %arg3[%7, %c0_6, %c0_7] : memref<4x8x128xf32, #tpu.memory_space<vmem>>, vector<1x8x128xf32>
    %9 = vector.shape_cast %8 : vector<1x8x128xf32> to vector<8x128xf32>
    %10 = arith.addf %6, %9 : vector<8x128xf32>
    %cst_8 = arith.constant 1.000000e+00 : f32
    %11 = arith.subf %cst_8, %0 : f32
    %12 = vector.broadcast %11 : f32 to vector<8x128xf32>
    %13 = arith.mulf %12, %5 : vector<8x128xf32>
    %cst_9 = arith.constant 0.000000e+00 : f32
    %14 = vector.broadcast %cst_9 : f32 to vector<8x128xf32>
    %15 = arith.maximumf %10, %14 : vector<8x128xf32>
    %16 = vector.broadcast %0 : f32 to vector<8x128xf32>
    %17 = arith.mulf %16, %15 : vector<8x128xf32>
    %18 = arith.addf %13, %17 : vector<8x128xf32>
    %19 = arith.index_cast %c0_i32_5 : i32 to index
    %c0_10 = arith.constant 0 : index
    %c0_11 = arith.constant 0 : index
    %20 = vector.load %arg5[%19, %c0_10, %c0_11] : memref<4x8x128xf32, #tpu.memory_space<vmem>>, vector<1x8x128xf32>
    %21 = vector.shape_cast %20 : vector<1x8x128xf32> to vector<8x128xf32>
    %22 = vector.shape_cast %18 : vector<8x128xf32> to vector<1x8x128xf32>
    tpu.vector_store %arg5[%19, %c0_10, %c0_11], %22 {strides = array<i32>} : memref<4x8x128xf32, #tpu.memory_space<vmem>>, vector<1x8x128xf32>,
    %c1_i32 = arith.constant 1 : i32
    %cst_12 = arith.constant dense<0.000000e+00> : vector<8x128xf32>
    %23 = tpu.matmul %18, %1, %cst_12 {dimension_numbers = #tpu.dot_dimension_numbers<[1], [0], [0], [1], [0, 0, 1, 1], [], []>} : vector<8x128xf32>, vector<128x128xf32>, vector<8x128xf32> -> vector<8x128xf32>
    %24 = arith.index_cast %c1_i32 : i32 to index
    %c0_13 = arith.constant 0 : index
    %c0_14 = arith.constant 0 : index
    %25 = vector.load %arg3[%24, %c0_13, %c0_14] : memref<4x8x128xf32, #tpu.memory_space<vmem>>, vector<1x8x128xf32>
    %26 = vector.shape_cast %25 : vector<1x8x128xf32> to vector<8x128xf32>
    %27 = arith.addf %23, %26 : vector<8x128xf32>
    %cst_15 = arith.constant 1.000000e+00 : f32
    %28 = arith.subf %cst_15, %0 : f32
    %29 = vector.broadcast %28 : f32 to vector<8x128xf32>
    %30 = arith.mulf %29, %18 : vector<8x128xf32>
    %cst_16 = arith.constant 0.000000e+00 : f32
    %31 = vector.broadcast %cst_16 : f32 to vector<8x128xf32>
    %32 = arith.maximumf %27, %31 : vector<8x128xf32>
    %33 = vector.broadcast %0 : f32 to vector<8x128xf32>
    %34 = arith.mulf %33, %32 : vector<8x128xf32>
    %35 = arith.addf %30, %34 : vector<8x128xf32>
    %36 = arith.index_cast %c1_i32 : i32 to index
    %c0_17 = arith.constant 0 : index
    %c0_18 = arith.constant 0 : index
    %37 = vector.load %arg5[%36, %c0_17, %c0_18] : memref<4x8x128xf32, #tpu.memory_space<vmem>>, vector<1x8x128xf32>
    %38 = vector.shape_cast %37 : vector<1x8x128xf32> to vector<8x128xf32>
    %39 = vector.shape_cast %35 : vector<8x128xf32> to vector<1x8x128xf32>
    tpu.vector_store %arg5[%36, %c0_17, %c0_18], %39 {strides = array<i32>} : memref<4x8x128xf32, #tpu.memory_space<vmem>>, vector<1x8x128xf32>,
    %c2_i32 = arith.constant 2 : i32
    %cst_19 = arith.constant dense<0.000000e+00> : vector<8x128xf32>
    %40 = tpu.matmul %35, %1, %cst_19 {dimension_numbers = #tpu.dot_dimension_numbers<[1], [0], [0], [1], [0, 0, 1, 1], [], []>} : vector<8x128xf32>, vector<128x128xf32>, vector<8x128xf32> -> vector<8x128xf32>
    %41 = arith.index_cast %c2_i32 : i32 to index
    %c0_20 = arith.constant 0 : index
    %c0_21 = arith.constant 0 : index
    %42 = vector.load %arg3[%41, %c0_20, %c0_21] : memref<4x8x128xf32, #tpu.memory_space<vmem>>, vector<1x8x128xf32>
    %43 = vector.shape_cast %42 : vector<1x8x128xf32> to vector<8x128xf32>
    %44 = arith.addf %40, %43 : vector<8x128xf32>
    %cst_22 = arith.constant 1.000000e+00 : f32
    %45 = arith.subf %cst_22, %0 : f32
    %46 = vector.broadcast %45 : f32 to vector<8x128xf32>
    %47 = arith.mulf %46, %35 : vector<8x128xf32>
    %cst_23 = arith.constant 0.000000e+00 : f32
    %48 = vector.broadcast %cst_23 : f32 to vector<8x128xf32>
    %49 = arith.maximumf %44, %48 : vector<8x128xf32>
    %50 = vector.broadcast %0 : f32 to vector<8x128xf32>
    %51 = arith.mulf %50, %49 : vector<8x128xf32>
    %52 = arith.addf %47, %51 : vector<8x128xf32>
    %53 = arith.index_cast %c2_i32 : i32 to index
    %c0_24 = arith.constant 0 : index
    %c0_25 = arith.constant 0 : index
    %54 = vector.load %arg5[%53, %c0_24, %c0_25] : memref<4x8x128xf32, #tpu.memory_space<vmem>>, vector<1x8x128xf32>
    %55 = vector.shape_cast %54 : vector<1x8x128xf32> to vector<8x128xf32>
    %56 = vector.shape_cast %52 : vector<8x128xf32> to vector<1x8x128xf32>
    tpu.vector_store %arg5[%53, %c0_24, %c0_25], %56 {strides = array<i32>} : memref<4x8x128xf32, #tpu.memory_space<vmem>>, vector<1x8x128xf32>,
    %c3_i32 = arith.constant 3 : i32
    %cst_26 = arith.constant dense<0.000000e+00> : vector<8x128xf32>
    %57 = tpu.matmul %52, %1, %cst_26 {dimension_numbers = #tpu.dot_dimension_numbers<[1], [0], [0], [1], [0, 0, 1, 1], [], []>} : vector<8x128xf32>, vector<128x128xf32>, vector<8x128xf32> -> vector<8x128xf32>
    %58 = arith.index_cast %c3_i32 : i32 to index
    %c0_27 = arith.constant 0 : index
    %c0_28 = arith.constant 0 : index
    %59 = vector.load %arg3[%58, %c0_27, %c0_28] : memref<4x8x128xf32, #tpu.memory_space<vmem>>, vector<1x8x128xf32>
    %60 = vector.shape_cast %59 : vector<1x8x128xf32> to vector<8x128xf32>
    %61 = arith.addf %57, %60 : vector<8x128xf32>
    %cst_29 = arith.constant 1.000000e+00 : f32
    %62 = arith.subf %cst_29, %0 : f32
    %63 = vector.broadcast %62 : f32 to vector<8x128xf32>
    %64 = arith.mulf %63, %52 : vector<8x128xf32>
    %cst_30 = arith.constant 0.000000e+00 : f32
    %65 = vector.broadcast %cst_30 : f32 to vector<8x128xf32>
    %66 = arith.maximumf %61, %65 : vector<8x128xf32>
    %67 = vector.broadcast %0 : f32 to vector<8x128xf32>
    %68 = arith.mulf %67, %66 : vector<8x128xf32>
    %69 = arith.addf %64, %68 : vector<8x128xf32>
    %70 = arith.index_cast %c3_i32 : i32 to index
    %c0_31 = arith.constant 0 : index
    %c0_32 = arith.constant 0 : index
    %71 = vector.load %arg5[%70, %c0_31, %c0_32] : memref<4x8x128xf32, #tpu.memory_space<vmem>>, vector<1x8x128xf32>
    %72 = vector.shape_cast %71 : vector<1x8x128xf32> to vector<8x128xf32>
    %73 = vector.shape_cast %69 : vector<8x128xf32> to vector<1x8x128xf32>
    tpu.vector_store %arg5[%70, %c0_31, %c0_32], %73 {strides = array<i32>} : memref<4x8x128xf32, #tpu.memory_space<vmem>>, vector<1x8x128xf32>,
    %c4_i32 = arith.constant 4 : i32
    %c0_33 = arith.constant 0 : index
    %c0_34 = arith.constant 0 : index
    %74 = vector.load %arg6[%c0_33, %c0_34] : memref<8x128xf32, #tpu.memory_space<vmem>>, vector<8x128xf32>
    tpu.vector_store %arg6[%c0_33, %c0_34], %69 {strides = array<i32>} : memref<8x128xf32, #tpu.memory_space<vmem>>, vector<8x128xf32>,
    return
  }
  func.func @transform_0(%arg0: i32, %arg1: i32) -> i32 {
    %c0_i32 = arith.constant 0 : i32
    %c0_i32_0 = arith.constant 0 : i32
    return %c0_i32 : i32
  }
  func.func @transform_1(%arg0: i32, %arg1: i32) -> (i32, i32, i32) {
    %c0_i32 = arith.constant 0 : i32
    %c0_i32_0 = arith.constant 0 : i32
    return %arg1, %arg0, %c0_i32 : i32, i32, i32
  }
  func.func @transform_2(%arg0: i32, %arg1: i32) -> (i32, i32) {
    %c0_i32 = arith.constant 0 : i32
    %c0_i32_0 = arith.constant 0 : i32
    %c0_i32_1 = arith.constant 0 : i32
    return %c0_i32, %c0_i32_0 : i32, i32
  }
  func.func @transform_3(%arg0: i32, %arg1: i32) -> (i32, i32, i32) {
    %c0_i32 = arith.constant 0 : i32
    %c0_i32_0 = arith.constant 0 : i32
    return %arg1, %arg0, %c0_i32 : i32, i32, i32
  }
}

</mosaic_0001>

<bundles_post_ra>
// kernel: tpu_custom_call.1
= control target key start
LH: loop header
LB: loop body
LE: loop exit
PB: predicated region body
PF: predicated region fallthrough
CT: control target
= control target key end

     0   :  { %s1569_s0 = inlined_call_operand.<no memory space> [shape: f32[1], index: 0, kind: input, shape index: {}]   ;;  %s1570_s1 = inlined_call_operand.hbm [shape: f32[8,8,128], index: 1, kind: input, shape index: {}]   ;;  %s1571_s2 = inlined_call_operand.hbm [shape: f32[128,128], index: 2, kind: input, shape index: {}]   ;;  %s1572_s3 = inlined_call_operand.hbm [shape: f32[8,8,128], index: 3, kind: output, shape index: {}]  }
   0x1   :  { %8 = sst [smem:[#allocation3]] %s1569_s0 }
   0x2   :  { %9 = vsyncpa [#allocation5], 0 }
   0x3   :  { %11 = vsyncpa [#allocation5 + $0x1], 0 }
   0x4   :  { %12 = vsyncpa [#allocation8], 0 }
   0x5   :  { %13 = vsyncpa [#allocation6], 0 }
   0x6   :  { %15 = vsyncpa [#allocation6 + $0x1], 0  ;;  %s1262_s14 = smov 0   ;;  %s1264_s15 = smov 0  }
   0x7   :  { %s1266_s16 = smov 0   ;;  %s1268_s17 = smov 0  }
   0x8   :  { %s1270_s18 = smov 0   ;;  %s1272_s19 = smov 0  }
   0x9 LB: > { %s671_s0 = sadd.s32 4294967295, %s1226_s19   ;;  %s672_s20 = sadd.s32 4294967294, %s1226_s19   ;;  %s1226_s19 = sphi %s1272_s19, %s21_s19   ;;  %s1222_s18 = sphi %s1270_s18, %s1596_s18   ;;  %s1218_s17 = sphi %s1268_s17, %s1595_s17   ;;  %s1214_s16 = sphi %s1266_s16, %s1594_s16   ;;  %s1210_s15 = sphi %s1264_s15, %s1593_s15   ;;  %s1206_s14 = sphi %s1262_s14, %s1592_s14  }
   0xa   : > { %p76_p0 = scmp.ne.s32.totalorder %s1210_s15, %s1206_s14  ;;  %p1296_p1 = scmp.eq.s32.totalorder %s671_s0, 0 }
   0xb   : > { %p1300_p2 = scmp.eq.s32.totalorder %s671_s0, 1  ;;  %p129_p3 = scmp.eq.s32.totalorder %s672_s20, 1 }
   0xc   : > { %s1577_s21 = scalar_select %p1296_p1, 1, 0 }
   0xd   : > { %s1578_s22 = scalar_select %p1300_p2, 1, 0 }
   0xe   : > { %p1306_p4 = por %p1296_p1, %p76_p0  ;;  %p673_p5 = scmp.ge.s32.totalorder %s1226_s19, 1 }
   0xf   : > { %p1311_p6 = por %p129_p3, %p76_p0  ;;  %p136_p7 = scmp.lt.s32.totalorder %s1226_s19, 3 }
  0x10   : > { %s1579_s23 = scalar_select %p1306_p4, 1, 0 }
  0x11   : > { %s1580_s24 = scalar_select %p1311_p6, 1, 0 }
  0x12   : > { %p1316_p8 = pnand %p673_p5, %p136_p7  ;;  %s1228_s26 = smov [#allocation7]  }
  0x13   : > { %s151_s27 = sshll.u32 %s1228_s26, 4  ;;  %s30_s29 = sadd.s32 1, %s1222_s18  ;;  %s152_s27 = int_to_ptr.vmem [resolvable:$true] %s151_s27 }
  0x14   : > { %s1581_s25 = scalar_select %p1316_p8, 1, 0 }
  0x15   : > { %p1009_p9 = pneg %p1316_p8  ;;  %s1082_s5 = scalar_lea.hbm %s1571_s2, 2048 }
  0x16   : > { %p1083_p12 = scmp.ne.s32.totalorder %s1571_s2, %s1082_s5  ;;  %p1089_p5 = scmp.lt.u32.totalorder %s1082_s5, %s1571_s2 }
  0x17   : > { %p1325_p11 = pnand %p1009_p9, %p1296_p1 }
  0x19   : > { %p1084_p13 = pneg %p1325_p11 }
  0x1b   : > { %p1085_p0 = pnand %p1084_p13, %p1083_p12 }
  0x1d   : > { %p1086_p3 = pneg %p1085_p0 }
  0x1f   : > { %p1091_p7 = pnand %p1089_p5, %p1086_p3 }
  0x21   : > { %1094 = shalt.err (!%p1091_p7)
}
  0x22   : > { %s1095_s10 = scalar_lea.vmem %s152_s27, 2048  ;;  %p1103_p1 = scmp.lt.s32.totalorder %s152_s27, %s152_s27 }
  0x23   : > { %p1096_p9 = scmp.ne.s32.totalorder %s152_s27, %s1095_s10  ;;  %p1104_p4 = scmp.lt.s32.totalorder %s1095_s10, %s1095_s10 }
  0x25   : > { %p1098_p10 = pnand %p1096_p9, %p1084_p13  ;;  %p1105_p8 = por %p1104_p4, %p1103_p1 }
  0x27   : > { %p1099_p6 = pneg %p1098_p10 }
  0x29   : > { %p1106_p2 = pnand %p1105_p8, %p1099_p6 }
  0x2b   : > { %1109 = shalt.err (!%p1106_p2)
}
  0x2c   : > { %s1229_s11 = smov 128   ;;  %s1230_s12 = smov 8  }
  0x2d   : > { %1012 = dma.hbm_to_vmem [thread:$0]  (!%p1325_p11), %s1571_s2, 2048, %s152_s27, [#allocation8], %s1229_s11, %s1229_s11, %s1230_s12  }
  0x2e   : > { %p31_p1 = scmp.ge.s32.totalorder %s30_s29, 2  ;;  %s63_s20 = sadd.s32 1, %s1214_s16 }
  0x2f   : > { %p70_p2 = scmp.ne.s32.totalorder %s1214_s16, %s1210_s15  ;;  %p71_p4 = scmp.eq.s32.totalorder %s1226_s19, 0 }
  0x30   : > { %s1598_s29 = smov (%p31_p1, %s30_s29), 0  ;;  %p1584_p8 = scmp.ne.s32.totalorder %s1578_s22, 0 }
  0x31   : > { %p1355_p6 = por %p71_p4, %p70_p2  ;;  %s58_s30 = ssub.s32 %s1222_s18, %s1598_s29 }
  0x32   : > { %p1361_p10 = por %p1584_p8, %p70_p2  ;;  %p1022_p12 = scmp.lt.s32.totalorder %s1226_s19, 2 }
  0x33   : > { %p61_p11 = scmp.eq.s32.totalorder %s58_s30, 0  ;;  %s165_s27 = sand.u32 1, %s1214_s16  }
  0x34   : > { %s676_s4 = sshll.u32 %s165_s27, 5  ;;  %s695_s6 = sshll.u32 %s1222_s18, 9 }
  0x35   : > { %s1370_s5 = scalar_select %p61_p11, %s1214_s16, %s63_s20  }
  0x36   : > { %s1376_s9 = scalar_lea.hbm %s1570_s1, %s695_s6  ;;  %s169_s22 = scalar_lea.vmem [#allocation4], %s676_s4 }
  0x37   : > { %s177_s10 = sshll.u32 %s169_s22, 4  ;;  %p1382_p13 = pnand %p1022_p12, %p1355_p6  ;;  %s1378_s10 = int_to_ptr.vmem [resolvable:$true] %s177_s10 }
  0x38   : > { %s1386_s0 = scalar_lea.sflag [#allocation5], %s165_s27  ;;  %s1110_s20 = scalar_lea.hbm %s1376_s9, 512 }
  0x39   : > { %p1111_p0 = scmp.ne.s32.totalorder %s1376_s9, %s1110_s20  ;;  %p1112_p3 = pneg %p1382_p13 }
  0x3a   : > { %s1115_s26 = scalar_lea.hbm %s1570_s1, 1024  ;;  %p1116_p9 = scmp.lt.u32.totalorder %s1376_s9, %s1570_s1 }
  0x3b   : > { %p1113_p5 = pnand %p1112_p3, %p1111_p0  ;;  %p1117_p1 = scmp.lt.u32.totalorder %s1115_s26, %s1110_s20 }
  0x3c   : > { %p1119_p4 = scmp.lt.u32.totalorder %s1110_s20, %s1376_s9 }
  0x3d   : > { %p1114_p7 = pneg %p1113_p5  ;;  %p1118_p2 = por %p1117_p1, %p1116_p9 }
  0x3f   : > { %p1120_p6 = por %p1119_p4, %p1118_p2 }
  0x41   : > { %p1121_p8 = pnand %p1120_p6, %p1114_p7 }
  0x43   : > { %1124 = shalt.err (!%p1121_p8)
}
  0x44   : > { %s1125_s27 = scalar_lea.vmem %s1378_s10, 512  ;;  %s1231_s8 = smov [#allocation4]  }
  0x45   : > { %p1126_p12 = scmp.ne.s32.totalorder %s1378_s10, %s1125_s27  ;;  %s1130_s22 = sshll.u32 %s1231_s8, 4  ;;  %s1131_s22 = int_to_ptr.vmem [resolvable:$false] %s1130_s22 }
  0x46   : > { %s1132_s30 = scalar_lea.vmem %s1131_s22, 1024  ;;  %p1133_p5 = scmp.lt.s32.totalorder %s1378_s10, %s1131_s22 }
  0x47   : > { %p1128_p11 = pnand %p1126_p12, %p1112_p3  ;;  %p1134_p9 = scmp.lt.s32.totalorder %s1132_s30, %s1125_s27 }
  0x49   : > { %p1129_p0 = pneg %p1128_p11  ;;  %p1135_p1 = por %p1134_p9, %p1133_p5 }
  0x4b   : > { %p1136_p2 = pnand %p1135_p1, %p1129_p0 }
  0x4d   : > { %1139 = shalt.err (!%p1136_p2)
}
  0x4e   : > { %1016 = dma.hbm_to_vmem [thread:$0]  (!%p1382_p13), %s1376_s9, 512, %s1378_s10, %s1386_s0, %s1229_s11, %s1229_s11, %s1230_s12  }
  0x4f   : > { %p1587_p3 = scmp.ne.s32.totalorder %s1581_s25, 0 }
  0x50   : > { %s1420_s20 = sand.u32 (!%p1587_p3), 1, %s1210_s15   ;;  %p1588_p7 = scmp.ne.s32.totalorder (!%p1587_p3), %s1579_s23, 0 }
  0x51   : > { %189 = sbr.rel (%p1587_p3) target bundleno = 1030 (0x406), region = 32  ;;  %s680_s4 = sshll.u32 (!%p1587_p3), %s1420_s20, 5 }
  0x52   : > { %s192_s26 = scalar_lea.sflag (!%p1587_p3), [#allocation5], %s1420_s20  ;;  %s1424_s6 = scalar_lea.vmem (!%p1587_p3), [#allocation4], %s680_s4 }
  0x58   : > { %1193 = dma.done.wait (%p1588_p7), %s192_s26, 512  }
  0x59   : > { %1195 = vsyncadd (%p1588_p7), %s192_s26, 4294966784  ;;  %p1589_p13 = scmp.ne.s32.totalorder %s1577_s21, 0 }
  0x5b   : > { %1197 = dma.done.wait (%p1589_p13), [#allocation8], 2048  }
  0x5c   : > { %1199 = vsyncadd (%p1589_p13), [#allocation8], 4294965248  ;;  %s1434_s25 = sld [smem:[#allocation3]]  ;;  %v225_v0 = vld [vmem:[#allocation7] sm:$0xff]  ;;  %v226_v1 = vld [vmem:[#allocation7 + $0x8] sm:$0xff]  ;;  %s1436_s21 = scalar_lea.vmem [#allocation9], %s680_s4 }
  0x5d   : > { %v227_v2 = vld [vmem:[#allocation7 + $0x10] sm:$0xff]  ;;  %v228_v3 = vld [vmem:[#allocation7 + $0x18] sm:$0xff]  ;;  %v229_v4 = vld [vmem:[#allocation7 + $0x20] sm:$0xff]  ;;  %p683_p4 = scmp.ne.s32.totalorder %s1218_s17, 0 }
  0x5e   : > { %v230_v5 = vld [vmem:[#allocation7 + $0x28] sm:$0xff]  ;;  %v231_v6 = vld [vmem:[#allocation7 + $0x30] sm:$0xff]  ;;  %v232_v7 = vld [vmem:[#allocation7 + $0x38] sm:$0xff]  ;;  %v1232_v16 = vmov (!%p683_p4), 0.0  }
  0x5f   : > { %v233_v8 = vld [vmem:[#allocation7 + $0x40] sm:$0xff]  ;;  %v234_v9 = vld [vmem:[#allocation7 + $0x48] sm:$0xff]  ;;  %v235_v10 = vld [vmem:[#allocation7 + $0x50] sm:$0xff]  ;;  %244 = sbr.rel (%p683_p4) target bundleno = 102 (0x66), region = 44  ;;  %245 = vst [vmem:[#allocation2] sm:$0xff] (!%p683_p4), %v1232_v16 }
  0x60   : > { %v236_v11 = vld [vmem:[#allocation7 + $0x58] sm:$0xff]  ;;  %v237_v12 = vld [vmem:[#allocation7 + $0x60] sm:$0xff]  ;;  %v238_v13 = vld [vmem:[#allocation7 + $0x68] sm:$0xff] }
  0x61   : > { %v239_v14 = vld [vmem:[#allocation7 + $0x70] sm:$0xff]  ;;  %v240_v15 = vld [vmem:[#allocation7 + $0x78] sm:$0xff] }
  0x66 PF: > { %v1439_v17 = vpack.c.bf16 %v226_v1, %v225_v0  ;;  %v1233_v18 = vmov 0.0|0.0   ;;  %v1443_v19 = vpack.c.bf16 %v228_v3, %v227_v2  ;;  %vm1234_vm0 = vmmov 0   ;;  %v246_v27 = vld [vmem:[#allocation2] sm:$0xff]  ;;  %s318_s23 = ssub.f32 1.0, %s1434_s25  ;;  %v247_v28 = vld [vmem:[%s1424_s6] sm:$0xff]  ;;  %v684_v38 = vld [vmem:[%s1424_s6 + $0x8] sm:$0xff] }
  0x67   : > { %905 = vmatprep.subr.bf16.mxu0 %v1233_v18  ;;  %929 = vmatprep.subr.bf16.mxu1 %v1233_v18  ;;  %v1235_v20 = vmov 0.0   ;;  %v1454_v21 = vpack.c.bf16 %v230_v5, %v229_v4  ;;  %v1460_v22 = vpack.c.bf16 %v232_v7, %v231_v6  ;;  %v918_v23 = vpack.c.bf16 %v234_v9, %v233_v8  ;;  %v686_v46 = vld [vmem:[%s1424_s6 + $0x10] sm:$0xff]  ;;  %v688_v54 = vld [vmem:[%s1424_s6 + $0x18] sm:$0xff]  ;;  %s696_s11 = sshll.u32 %s1218_s17, 9  ;;  %s576_s12 = sshll.u32 %s1436_s21, 4  ;;  %s1519_s12 = int_to_ptr.vmem [resolvable:$true] %s576_s12 }
  0x68   : > { %907 = vmatpush3.bf16.msra.mxu0 %v1439_v17  ;;  %797 = vmatprep.mubr.msk.f32.mxu0 %vm1234_vm0, %v1235_v20  ;;  %v921_v24 = vpack.c.bf16 %v236_v11, %v235_v10  ;;  %v924_v25 = vpack.c.bf16 %v238_v13, %v237_v12  ;;  %v927_v26 = vpack.c.bf16 %v240_v15, %v239_v14  ;;  %v319_v29 = vstv %s318_s23  ;;  %s1517_s13 = scalar_lea.hbm %s1572_s3, %s696_s11  ;;  %s562_s0 = scalar_lea.sflag [#allocation6], %s1420_s20 }
  0x69   : > { %908 = vmatprep.subr.bf16.mxu0 %v1233_v18  ;;  %931 = vmatpush3.bf16.msra.mxu1 %v1439_v17  ;;  %v322_v33 = vstv %s1434_s25  ;;  %v320_v34 = vmul.f32 %v319_v29, %v246_v27  ;;  %s1140_s7 = scalar_lea.vmem %s1519_s12, 512  ;;  %s1236_s17 = smov [#allocation9]  }
  0x6a   : > { %832 = vmatprep.mubr.msk.f32.mxu1 %vm1234_vm0, %v1235_v20  ;;  %932 = vmatprep.subr.bf16.mxu1 %v1233_v18  ;;  %p1141_p6 = scmp.ne.s32.totalorder %s1519_s12, %s1140_s7  ;;  %s1144_s27 = sshll.u32 %s1236_s17, 4  ;;  %s1145_s27 = int_to_ptr.vmem [resolvable:$false] %s1144_s27 }
  0x6b   : > { %s1146_s8 = scalar_lea.vmem %s1145_s27, 1024  ;;  %p1147_p11 = scmp.lt.s32.totalorder %s1519_s12, %s1145_s27 }
  0x6c   : > { %910 = vmatpush3.bf16.msra.mxu0 %v1443_v19  ;;  %p1142_p8 = pnand %p1141_p6, %p1361_p10  ;;  %p1148_p0 = scmp.lt.s32.totalorder %s1146_s8, %s1140_s7 }
  0x6d   : > { %911 = vmatprep.subr.bf16.mxu0 %v1233_v18  ;;  %934 = vmatpush3.bf16.msra.mxu1 %v1443_v19 }
  0x6e   : > { %935 = vmatprep.subr.bf16.mxu1 %v1233_v18  ;;  %p1143_p12 = pneg %p1142_p8  ;;  %p1149_p5 = por %p1148_p0, %p1147_p11 }
  0x70   : > { %913 = vmatpush3.bf16.msra.mxu0 %v1454_v21  ;;  %p1150_p9 = pnand %p1149_p5, %p1143_p12 }
  0x71   : > { %914 = vmatprep.subr.bf16.mxu0 %v1233_v18  ;;  %937 = vmatpush3.bf16.msra.mxu1 %v1454_v21 }
  0x72   : > { %938 = vmatprep.subr.bf16.mxu1 %v1233_v18 }
  0x74   : > { %916 = vmatpush3.bf16.msra.mxu0 %v1460_v22 }
  0x75   : > { %917 = vmatprep.subr.bf16.mxu0 %v1233_v18  ;;  %940 = vmatpush3.bf16.msra.mxu1 %v1460_v22 }
  0x76   : > { %941 = vmatprep.subr.bf16.mxu1 %v1233_v18 }
  0x78   : > { %919 = vmatpush3.bf16.msra.mxu0 %v918_v23 }
  0x79   : > { %920 = vmatprep.subr.bf16.mxu0 %v1233_v18  ;;  %943 = vmatpush3.bf16.msra.mxu1 %v918_v23 }
  0x7a   : > { %944 = vmatprep.subr.bf16.mxu1 %v1233_v18 }
  0x7c   : > { %922 = vmatpush3.bf16.msra.mxu0 %v921_v24 }
  0x7d   : > { %923 = vmatprep.subr.bf16.mxu0 %v1233_v18  ;;  %946 = vmatpush3.bf16.msra.mxu1 %v921_v24 }
  0x7e   : > { %947 = vmatprep.subr.bf16.mxu1 %v1233_v18 }
  0x80   : > { %925 = vmatpush3.bf16.msra.mxu0 %v924_v25 }
  0x81   : > { %926 = vmatprep.subr.bf16.mxu0 %v1233_v18  ;;  %949 = vmatpush3.bf16.msra.mxu1 %v924_v25 }
  0x82   : > { %950 = vmatprep.subr.bf16.mxu1 %v1233_v18 }
  0x84   : > { %928 = vmatpush3.bf16.msra.mxu0 %v927_v26 }
  0x85   : > { %953 = vmatprep.subr.bf16.mxu0 %v1233_v18  ;;  %952 = vmatpush3.bf16.msra.mxu1 %v927_v26 }
  0x86   : > { %977 = vmatprep.subr.bf16.mxu1 %v1233_v18 }
  0x87   : > { %798 = vmatmul.mubr.f32.vlgmr.msra.gmra.mrb[0].mxu0 %v246_v27 }
  0x88   : > { %955 = vmatpush3.bf16.msra.mxu0 %v1439_v17  ;;  %867 = vmatprep.mubr.msk.f32.mxu0 %vm1234_vm0, %v1235_v20 }
  0x89   : > { %956 = vmatprep.subr.bf16.mxu0 %v1233_v18 }
  0x8c   : > { %958 = vmatpush3.bf16.msra.mxu0 %v1443_v19 }
  0x8d   : > { %959 = vmatprep.subr.bf16.mxu0 %v1233_v18 }
  0x90   : > { %961 = vmatpush3.bf16.msra.mxu0 %v1454_v21 }
  0x91   : > { %962 = vmatprep.subr.bf16.mxu0 %v1233_v18 }
  0x94   : > { %964 = vmatpush3.bf16.msra.mxu0 %v1460_v22 }
  0x95   : > { %965 = vmatprep.subr.bf16.mxu0 %v1233_v18 }
  0x98   : > { %967 = vmatpush3.bf16.msra.mxu0 %v918_v23 }
  0x99   : > { %968 = vmatprep.subr.bf16.mxu0 %v1233_v18 }
  0x9c   : > { %970 = vmatpush3.bf16.msra.mxu0 %v921_v24 }
  0x9d   : > { %971 = vmatprep.subr.bf16.mxu0 %v1233_v18 }
  0xa0   : > { %973 = vmatpush3.bf16.msra.mxu0 %v924_v25 }
  0xa1   : > { %974 = vmatprep.subr.bf16.mxu0 %v1233_v18 }
  0xa4   : > { %976 = vmatpush3.bf16.msra.mxu0 %v927_v26 }
 0x15a   : > { %v314_v30 = vpop.f32.mrb[0].mxu0 }
 0x15b   : > { %v315_v31 = vadd.f32 %v314_v30, %v247_v28  ;;  %v799_v32 = vpop.f32.mrb[1].mxu0 }
 0x15d   : > { %v321_v35 = vmax.f32 %v315_v31, 0.0 }
 0x15f   : > { %v323_v36 = vmul.f32 %v322_v33, %v321_v35 }
 0x161   : > { %v324_v37 = vadd.f32 %v323_v36, %v320_v34 }
 0x163   : > { %325 = vst [vmem:[%s1436_s21] sm:$0xff] %v324_v37  ;;  %833 = vmatmul.mubr.f32.vlgmr.msra.gmra.mrb[0].mxu1 %v324_v37  ;;  %v398_v43 = vmul.f32 %v324_v37, %v319_v29 }
 0x164   : > { %979 = vmatpush3.bf16.msra.mxu1 %v1439_v17  ;;  %902 = vmatprep.mubr.msk.f32.mxu1 %vm1234_vm0, %v1235_v20 }
 0x165   : > { %980 = vmatprep.subr.bf16.mxu1 %v1233_v18 }
 0x168   : > { %982 = vmatpush3.bf16.msra.mxu1 %v1443_v19 }
 0x169   : > { %983 = vmatprep.subr.bf16.mxu1 %v1233_v18 }
 0x16c   : > { %985 = vmatpush3.bf16.msra.mxu1 %v1454_v21 }
 0x16d   : > { %986 = vmatprep.subr.bf16.mxu1 %v1233_v18 }
 0x170   : > { %988 = vmatpush3.bf16.msra.mxu1 %v1460_v22 }
 0x171   : > { %989 = vmatprep.subr.bf16.mxu1 %v1233_v18 }
 0x174   : > { %991 = vmatpush3.bf16.msra.mxu1 %v918_v23 }
 0x175   : > { %992 = vmatprep.subr.bf16.mxu1 %v1233_v18 }
 0x178   : > { %994 = vmatpush3.bf16.msra.mxu1 %v921_v24 }
 0x179   : > { %995 = vmatprep.subr.bf16.mxu1 %v1233_v18 }
 0x17c   : > { %997 = vmatpush3.bf16.msra.mxu1 %v924_v25 }
 0x17d   : > { %998 = vmatprep.subr.bf16.mxu1 %v1233_v18 }
 0x180   : > { %1000 = vmatpush3.bf16.msra.mxu1 %v927_v26 }
 0x236   : > { %v394_v39 = vpop.f32.mrb[0].mxu1 }
 0x237   : > { %v395_v40 = vadd.f32 %v684_v38, %v394_v39  ;;  %v834_v41 = vpop.f32.mrb[1].mxu1 }
 0x239   : > { %v399_v42 = vmax.f32 %v395_v40, 0.0 }
 0x23b   : > { %v400_v44 = vmul.f32 %v399_v42, %v322_v33 }
 0x23d   : > { %v401_v45 = vadd.f32 %v400_v44, %v398_v43 }
 0x23f   : > { %685 = vst [vmem:[%s1436_s21 + $0x8] sm:$0xff] %v401_v45  ;;  %868 = vmatmul.mubr.f32.vlgmr.msra.gmra.mrb[2].mxu0 %v401_v45  ;;  %v476_v51 = vmul.f32 %v401_v45, %v319_v29 }
 0x312   : > { %v472_v47 = vpop.f32.mrb[2].mxu0 }
 0x313   : > { %v473_v48 = vadd.f32 %v686_v46, %v472_v47  ;;  %v869_v49 = vpop.f32.mrb[3].mxu0 }
 0x315   : > { %v477_v50 = vmax.f32 %v473_v48, 0.0 }
 0x317   : > { %v478_v52 = vmul.f32 %v477_v50, %v322_v33 }
 0x319   : > { %v479_v53 = vadd.f32 %v478_v52, %v476_v51 }
 0x31b   : > { %687 = vst [vmem:[%s1436_s21 + $0x10] sm:$0xff] %v479_v53  ;;  %903 = vmatmul.mubr.f32.vlgmr.msra.gmra.mrb[2].mxu1 %v479_v53  ;;  %v554_v59 = vmul.f32 %v479_v53, %v319_v29 }
 0x3ee   : > { %v550_v55 = vpop.f32.mrb[2].mxu1 }
 0x3ef   : > { %v551_v56 = vadd.f32 %v688_v54, %v550_v55  ;;  %v904_v57 = vpop.f32.mrb[3].mxu1 }
 0x3f1   : > { %v555_v58 = vmax.f32 %v551_v56, 0.0 }
 0x3f3   : > { %v556_v60 = vmul.f32 %v555_v58, %v322_v33 }
 0x3f5   : > { %v557_v61 = vadd.f32 %v556_v60, %v554_v59 }
 0x3f7   : > { %689 = vst [vmem:[%s1436_s21 + $0x18] sm:$0xff] %v557_v61  ;;  %560 = vst [vmem:[#allocation2] sm:$0xff] %v557_v61 }
 0x3f8   : > { %1153 = shalt.err (!%p1150_p9)
}
 0x3f9   : > { %s1154_s22 = scalar_lea.hbm %s1517_s13, 512  ;;  %s1158_s26 = scalar_lea.hbm %s1572_s3, 1024 }
 0x3fa   : > { %p1155_p1 = scmp.ne.s32.totalorder %s1517_s13, %s1154_s22  ;;  %p1159_p7 = scmp.lt.u32.totalorder %s1517_s13, %s1572_s3 }
 0x3fb   : > { %p1160_p13 = scmp.lt.u32.totalorder %s1158_s26, %s1154_s22  ;;  %p1162_p6 = scmp.lt.u32.totalorder %s1154_s22, %s1517_s13 }
 0x3fc   : > { %p1156_p2 = pnand %p1155_p1, %p1361_p10 }
 0x3fd   : > { %p1161_p4 = por %p1160_p13, %p1159_p7 }
 0x3fe   : > { %p1157_p3 = pneg %p1156_p2 }
 0x3ff   : > { %p1163_p8 = por %p1162_p6, %p1161_p4 }
 0x401   : > { %p1164_p12 = pnand %p1163_p8, %p1157_p3 }
 0x403   : > { %1167 = shalt.err (!%p1164_p12)
}
 0x404   : > { %s1237_s21 = smov 128   ;;  %s1238_s23 = smov 8  }
 0x405   : > { %1007 = dma.vmem_to_hbm [thread:$0]  (%p1361_p10), %s1519_s12, 512, %s1517_s13, %s562_s0, %s1237_s21, %s1237_s21, %s1238_s23  }
 0x406 PF: > { %s591_s11 = sand.u32 1, %s1206_s14   ;;  %p1590_p11 = scmp.ne.s32.totalorder %s1580_s24, 0 }
 0x407   : > { %p1591_p0 = scmp.ge.s32.totalorder %s1226_s19, 2  ;;  %s592_s9 = scalar_lea.sflag [#allocation6], %s591_s11 }
 0x409   : > { %p1018_p5 = pnand %p1591_p0, %p1590_p11 }
 0x40b   : > { %1201 = dma.done.wait (!%p1018_p5), %s592_s9, 512  }
 0x40c   : > { %1203 = vsyncadd (!%p1018_p5), %s592_s9, 4294966784  ;;  %s21_s19 = sadd.s32 1, %s1226_s19   ;;  %s1592_s14 = smov %s1210_s15 }
 0x40d   : > { %p18_p9 = scmp.ge.s32.totalorder %s21_s19, 4   ;;  %s1593_s15 = smov %s1214_s16 }
 0x40e   : > { %s1594_s16 = smov %s1370_s5  ;;  %s1595_s17 = smov %s1222_s18 }
 0x40f   : > { %s1596_s18 = smov %s1598_s29  ;;  %20 = sbr.rel (!%p18_p9) target bundleno = 9 (0x9), region = 91 }
 0x416   :  { %597 = vsyncpa [#allocation5], 1 }
 0x417   :  { %599 = vsyncpa [#allocation5 + $0x1], 1 }
 0x418   :  { %600 = vsyncpa [#allocation8], 1 }
 0x419   :  { %601 = vsyncpa [#allocation6], 1 }
 0x41a   :  { %603 = vsyncpa [#allocation6 + $0x1], 1 }

</bundles_post_ra>
